<compile_context>
chip_gen: v7x
topology: tpu7x:2x2x1
jax: 0.10.0
libtpu: 0.0.40
codegen_flags: <defaults>
</compile_context>

<pallas_src>
import jax
import jax.numpy as jnp
from jax import lax
from jax.experimental import pallas as pl
from jax.experimental.pallas import tpu as pltpu

LN_EPS = 1e-5                       # torch.nn.LayerNorm default
LOG_STD_MIN = -2.0
LOG_STD_MAX = 2.0

EYE_DIM, CLICK_DIM = 13, 15
STATE_DIM = EYE_DIM + CLICK_DIM
MEAN_DIM, LOGSTD_DIM, HIDDEN = 8, 5, 10
OUT_PAD = 128                       # single lane-dense output slab for BOTH heads
HALF = OUT_PAD // 2                 # mean head -> lanes [0,HALF), log_std -> [HALF,OUT_PAD)

PACKED_NAMES = ("w1_pk", "w2_pk", "vec_pk", "w3_comb", "wse_comb", "wsc_comb", "bo_comb")


def _round_up(x, m):
    return ((x + m - 1) // m) * m


def _layernorm(x, gamma, beta):
    # PyTorch LayerNorm: biased variance over last dim, elementwise affine, f32 math.
    mean = jnp.mean(x, axis=-1, keepdims=True)
    c = x - mean
    var = jnp.mean(c * c, axis=-1, keepdims=True)
    return c * lax.rsqrt(var + LN_EPS) * gamma + beta


def _policy_math(eye, click, w1_pk, w2_pk, vec_pk, w3_comb, wse_comb, wsc_comb, bo_comb):
    """Shared by kernel and pure-JAX reference. bf16 matmuls / f32 accumulation,
    f32 pointwise math. Returns the combined (rows, 128) output slab with the
    log_std half already clamped to [LOG_STD_MIN, LOG_STD_MAX]."""
    cdt = w1_pk.dtype
    eye_c = eye.astype(cdt)          # cast once; shared by both branches & the skip matmuls
    click_c = click.astype(cdt)

    def hidden(b):
        # Layer 1: split-by-rows partial matmuls replace cat([eye, click]) @ W1.
        w1e = w1_pk[b, :EYE_DIM]
        w1c = w1_pk[b, EYE_DIM:]
        b1, g1, be1, b2, g2, be2 = (vec_pk[b, i:i + 1] for i in range(6))
        h = (jnp.dot(eye_c, w1e, preferred_element_type=jnp.float32)
             + jnp.dot(click_c, w1c, preferred_element_type=jnp.float32) + b1)
        h = jnp.maximum(_layernorm(h, g1, be1), 0.0)
        h = jnp.dot(h.astype(cdt), w2_pk[b], preferred_element_type=jnp.float32) + b2
        h = jnp.maximum(_layernorm(h, g2, be2), 0.0)
        return h

    # Fused epilogue: both heads' last Linear + linear skip in 3 matmuls, biases pre-folded.
    h_cat = jnp.concatenate([hidden(0), hidden(1)], axis=-1).astype(cdt)   # (rows, 2*HIDDEN)
    out = (jnp.dot(h_cat, w3_comb, preferred_element_type=jnp.float32)
           + jnp.dot(eye_c, wse_comb, preferred_element_type=jnp.float32)
           + jnp.dot(click_c, wsc_comb, preferred_element_type=jnp.float32)
           + bo_comb)

    # Clamp only the log_std half (lanes >= HALF); padded lanes are zero and stay zero.
    col = lax.broadcasted_iota(jnp.int32, out.shape, 1)
    return jnp.where(col >= HALF, jnp.clip(out, LOG_STD_MIN, LOG_STD_MAX), out)


def policy_kernel(eye_ref, click_ref, w1_ref, w2_ref, vec_ref,
                  w3_ref, wse_ref, wsc_ref, bo_ref, out_ref):
    out = _policy_math(eye_ref[...], click_ref[...],
                       w1_ref[...], w2_ref[...], vec_ref[...],
                       w3_ref[...], wse_ref[...], wsc_ref[...], bo_ref[...])
    out_ref[...] = out.astype(out_ref.dtype)


def _pick_tiling(batch, max_tile_b=512, target_min_tiles=2):
    """Tile rows = round_up(cdiv(B, n_tiles), 8): minimal padding, >=2 tiles when B >= 16
    (so both v7x TensorCores get work), large tiles for large B (amortize grid-step cost)."""
    b8 = _round_up(max(batch, 1), 8)
    n_tiles = max(-(-b8 // max_tile_b), target_min_tiles)
    n_tiles = min(n_tiles, b8 // 8)          # never below 8-row (one-sublane-group) tiles
    n_tiles = max(n_tiles, 1)
    tile_b = _round_up(-(-b8 // n_tiles), 8)
    n_tiles = -(-b8 // tile_b)
    return tile_b, n_tiles, tile_b * n_tiles


def policy_net_forward(eye_list, click_, params, *, max_tile_b=512, interpret=False):
    """PolicyNet.forward: returns (mean (B,8), log_std (B,5) clamped to [-2, 2])."""
    B = eye_list.shape[0]
    tile_b, n_tiles, b_pad = _pick_tiling(B, max_tile_b)

    if b_pad != B:
        eye_list = jnp.pad(eye_list, ((0, b_pad - B), (0, 0)))
        click_ = jnp.pad(click_, ((0, b_pad - B), (0, 0)))

    weights = [params[k] for k in PACKED_NAMES]

    def tile_spec(dim):
        return pl.BlockSpec((tile_b, dim), lambda i: (i, 0))

    def resident_spec(w):
        # Constant block index -> weight DMA'd to VMEM once, reused by every batch tile.
        if w.ndim == 2:
            return pl.BlockSpec(w.shape, lambda i: (0, 0))
        return pl.BlockSpec(w.shape, lambda i: (0, 0, 0))

    grid_spec = pltpu.PrefetchScalarGridSpec(
        num_scalar_prefetch=0,
        grid=(n_tiles,),
        in_specs=[tile_spec(EYE_DIM), tile_spec(CLICK_DIM)]
                 + [resident_spec(w) for w in weights],
        out_specs=pl.BlockSpec((tile_b, OUT_PAD), lambda i: (i, 0)),
    )

    out_pad = pl.pallas_call(
        policy_kernel,
        out_shape=jax.ShapeDtypeStruct((b_pad, OUT_PAD), jnp.float32),
        grid_spec=grid_spec,
        compiler_params=pltpu.CompilerParams(
            dimension_semantics=("parallel",)),   # batch tiles shard across TCs on v7x
        interpret=interpret,
    )(eye_list, click_, *weights)

    return out_pad[:B, :MEAN_DIM], out_pad[:B, HALF:HALF + LOGSTD_DIM]


# ----------------------------- parameter construction -----------------------------

def _init_branch_raw(key, out_dim, hidden=HIDDEN):
    """Raw torch-style f32 params for one MLPDRL2 branch (PyTorch default Linear init)."""
    ks = jax.random.split(key, 4)

    def lin(k, fan_in, fan_out):
        bound = 1.0 / (fan_in ** 0.5)
        kw, kb = jax.random.split(k)
        w = jax.random.uniform(kw, (fan_in, fan_out), jnp.float32, -bound, bound)
        b = jax.random.uniform(kb, (fan_out,), jnp.float32, -bound, bound)
        return w, b

    w1, b1 = lin(ks[0], STATE_DIM, hidden)
    w2, b2 = lin(ks[1], hidden, hidden)
    w3, b3 = lin(ks[2], hidden, out_dim)
    wm, bm = lin(ks[3], STATE_DIM, out_dim)
    ones = jnp.ones((hidden,), jnp.float32)
    zeros = jnp.zeros((hidden,), jnp.float32)
    return dict(w1=w1, b1=b1, g1=ones, be1=zeros,
                w2=w2, b2=b2, g2=ones, be2=zeros,
                w3=w3, b3=b3, wm=wm, bm=bm)


def pack_params(raw_mean, raw_std, weight_dtype=jnp.bfloat16):
    """Pack both branches' params into 7 kernel operands; combined-head epilogue weights
    put the mean head in lanes [0,64) and the log_std head in lanes [64,128)."""
    wd = weight_dtype

    def stack_w(name):
        return jnp.stack([raw_mean[name], raw_std[name]]).astype(wd)

    def vec_block(raw):
        return jnp.stack([raw["b1"], raw["g1"], raw["be1"],
                          raw["b2"], raw["g2"], raw["be2"]])

    w1_pk = stack_w("w1")                                            # (2, 28, H) bf16
    w2_pk = stack_w("w2")                                            # (2, H, H)  bf16
    vec_pk = jnp.stack([vec_block(raw_mean),
                        vec_block(raw_std)]).astype(jnp.float32)     # (2, 6, H)  f32

    w3_comb = jnp.zeros((2 * HIDDEN, OUT_PAD), jnp.float32)
    w3_comb = w3_comb.at[:HIDDEN, :MEAN_DIM].set(raw_mean["w3"])
    w3_comb = w3_comb.at[HIDDEN:, HALF:HALF + LOGSTD_DIM].set(raw_std["w3"])

    wse_comb = jnp.zeros((EYE_DIM, OUT_PAD), jnp.float32)
    wse_comb = wse_comb.at[:, :MEAN_DIM].set(raw_mean["wm"][:EYE_DIM])
    wse_comb = wse_comb.at[:, HALF:HALF + LOGSTD_DIM].set(raw_std["wm"][:EYE_DIM])

    wsc_comb = jnp.zeros((CLICK_DIM, OUT_PAD), jnp.float32)
    wsc_comb = wsc_comb.at[:, :MEAN_DIM].set(raw_mean["wm"][EYE_DIM:])
    wsc_comb = wsc_comb.at[:, HALF:HALF + LOGSTD_DIM].set(raw_std["wm"][EYE_DIM:])

    bo_comb = jnp.zeros((1, OUT_PAD), jnp.float32)                   # b3 + bm pre-folded
    bo_comb = bo_comb.at[0, :MEAN_DIM].set(raw_mean["b3"] + raw_mean["bm"])
    bo_comb = bo_comb.at[0, HALF:HALF + LOGSTD_DIM].set(raw_std["b3"] + raw_std["bm"])

    return dict(w1_pk=w1_pk, w2_pk=w2_pk, vec_pk=vec_pk,
                w3_comb=w3_comb.astype(wd), wse_comb=wse_comb.astype(wd),
                wsc_comb=wsc_comb.astype(wd), bo_comb=bo_comb)


def init_params(key, weight_dtype=jnp.bfloat16):
    k_mean, k_std = jax.random.split(key)
    return pack_params(_init_branch_raw(k_mean, MEAN_DIM),
                       _init_branch_raw(k_std, LOGSTD_DIM),
                       weight_dtype)


def policy_net_reference(eye_list, click_, params):
    """Pure-JAX reference using identical compute dtypes (bf16 matmuls, f32 accum)."""
    out = _policy_math(eye_list.astype(jnp.float32), click_.astype(jnp.float32),
                       *[params[k] for k in PACKED_NAMES])
    return out[:, :MEAN_DIM], out[:, HALF:HALF + LOGSTD_DIM]


if __name__ == "__main__":
    B = 4
    key = jax.random.PRNGKey(0)
    k_eye, k_click, k_params = jax.random.split(key, 3)

    eye_list = jax.random.normal(k_eye, (B, EYE_DIM), jnp.float32)
    click_ = jax.random.normal(k_click, (B, CLICK_DIM), jnp.float32)
    params = init_params(k_params)

    mean, log_std = policy_net_forward(eye_list, click_, params)
    mean = jax.block_until_ready(mean)
    log_std = jax.block_until_ready(log_std)

    mean_ref, log_std_ref = policy_net_reference(eye_list, click_, params)

    assert mean.shape == (B, MEAN_DIM) and log_std.shape == (B, LOGSTD_DIM)
    assert bool(jnp.all(jnp.isfinite(mean))) and bool(jnp.all(jnp.isfinite(log_std)))
    assert bool(jnp.all(log_std >= LOG_STD_MIN)) and bool(jnp.all(log_std <= LOG_STD_MAX))
    assert bool(jnp.allclose(mean, mean_ref, atol=1e-3, rtol=1e-3)), "mean mismatch vs JAX reference"
    assert bool(jnp.allclose(log_std, log_std_ref, atol=1e-3, rtol=1e-3)), "log_std mismatch vs JAX reference"

    print("KERNEL_OK")
</pallas_src>

<mosaic_0001>
module attributes {stable_mosaic.version = 11 : i64} {
  func.func @policy_kernel(%arg0: i32, %arg1: memref<8x13xf32, #tpu.memory_space<vmem>>, %arg2: memref<8x15xf32, #tpu.memory_space<vmem>>, %arg3: memref<2x28x10xbf16, #tpu.memory_space<vmem>>, %arg4: memref<2x10x10xbf16, #tpu.memory_space<vmem>>, %arg5: memref<2x6x10xf32, #tpu.memory_space<vmem>>, %arg6: memref<20x128xbf16, #tpu.memory_space<vmem>>, %arg7: memref<13x128xbf16, #tpu.memory_space<vmem>>, %arg8: memref<15x128xbf16, #tpu.memory_space<vmem>>, %arg9: memref<1x128xf32, #tpu.memory_space<vmem>>, %arg10: memref<8x128xf32, #tpu.memory_space<vmem>>) attributes {dimension_semantics = [#tpu.dimension_semantics<parallel>], iteration_bounds = array<i64: 1>, scalar_prefetch = 0 : i64, scratch_operands = 0 : i64, tpu.core_type = #tpu.core_type<tc>, window_params = [{transform_indices = @transform_0, window_bounds = array<i64: 8, 13>}, {transform_indices = @transform_1, window_bounds = array<i64: 8, 15>}, {pipeline_mode = #tpu.pipeline_mode<synchronous>, transform_indices = @transform_2, window_bounds = array<i64: 2, 28, 10>}, {pipeline_mode = #tpu.pipeline_mode<synchronous>, transform_indices = @transform_3, window_bounds = array<i64: 2, 10, 10>}, {pipeline_mode = #tpu.pipeline_mode<synchronous>, transform_indices = @transform_4, window_bounds = array<i64: 2, 6, 10>}, {pipeline_mode = #tpu.pipeline_mode<synchronous>, transform_indices = @transform_5, window_bounds = array<i64: 20, 128>}, {pipeline_mode = #tpu.pipeline_mode<synchronous>, transform_indices = @transform_6, window_bounds = array<i64: 13, 128>}, {pipeline_mode = #tpu.pipeline_mode<synchronous>, transform_indices = @transform_7, window_bounds = array<i64: 15, 128>}, {pipeline_mode = #tpu.pipeline_mode<synchronous>, transform_indices = @transform_8, window_bounds = array<i64: 1, 128>}, {transform_indices = @transform_9, window_bounds = array<i64: 8, 128>}]} {
    %c0 = arith.constant 0 : index
    %c0_0 = arith.constant 0 : index
    %0 = vector.load %arg1[%c0, %c0_0] : memref<8x13xf32, #tpu.memory_space<vmem>>, vector<8x13xf32>
    %c0_1 = arith.constant 0 : index
    %c0_2 = arith.constant 0 : index
    %1 = vector.load %arg2[%c0_1, %c0_2] : memref<8x15xf32, #tpu.memory_space<vmem>>, vector<8x15xf32>
    %c0_3 = arith.constant 0 : index
    %c0_4 = arith.constant 0 : index
    %c0_5 = arith.constant 0 : index
    %2 = vector.load %arg3[%c0_3, %c0_4, %c0_5] : memref<2x28x10xbf16, #tpu.memory_space<vmem>>, vector<2x28x10xbf16>
    %c0_6 = arith.constant 0 : index
    %c0_7 = arith.constant 0 : index
    %c0_8 = arith.constant 0 : index
    %3 = vector.load %arg4[%c0_6, %c0_7, %c0_8] : memref<2x10x10xbf16, #tpu.memory_space<vmem>>, vector<2x10x10xbf16>
    %c0_9 = arith.constant 0 : index
    %c0_10 = arith.constant 0 : index
    %c0_11 = arith.constant 0 : index
    %4 = vector.load %arg5[%c0_9, %c0_10, %c0_11] : memref<2x6x10xf32, #tpu.memory_space<vmem>>, vector<2x6x10xf32>
    %c0_12 = arith.constant 0 : index
    %c0_13 = arith.constant 0 : index
    %5 = vector.load %arg6[%c0_12, %c0_13] : memref<20x128xbf16, #tpu.memory_space<vmem>>, vector<20x128xbf16>
    %c0_14 = arith.constant 0 : index
    %c0_15 = arith.constant 0 : index
    %6 = vector.load %arg7[%c0_14, %c0_15] : memref<13x128xbf16, #tpu.memory_space<vmem>>, vector<13x128xbf16>
    %c0_16 = arith.constant 0 : index
    %c0_17 = arith.constant 0 : index
    %7 = vector.load %arg8[%c0_16, %c0_17] : memref<15x128xbf16, #tpu.memory_space<vmem>>, vector<15x128xbf16>
    %c0_18 = arith.constant 0 : index
    %c0_19 = arith.constant 0 : index
    %8 = vector.load %arg9[%c0_18, %c0_19] : memref<1x128xf32, #tpu.memory_space<vmem>>, vector<1x128xf32>
    %9 = arith.truncf %0 : vector<8x13xf32> to vector<8x13xbf16>
    %10 = arith.truncf %1 : vector<8x15xf32> to vector<8x15xbf16>
    %11 = vector.extract_strided_slice %2 {offsets = [0, 0, 0], sizes = [1, 13, 10], strides = [1, 1, 1]} : vector<2x28x10xbf16> to vector<1x13x10xbf16>
    %12 = vector.shape_cast %11 : vector<1x13x10xbf16> to vector<13x10xbf16>
    %13 = vector.extract_strided_slice %2 {offsets = [0, 13, 0], sizes = [1, 15, 10], strides = [1, 1, 1]} : vector<2x28x10xbf16> to vector<1x15x10xbf16>
    %14 = vector.shape_cast %13 : vector<1x15x10xbf16> to vector<15x10xbf16>
    %15 = vector.extract_strided_slice %4 {offsets = [0, 0, 0], sizes = [1, 1, 10], strides = [1, 1, 1]} : vector<2x6x10xf32> to vector<1x1x10xf32>
    %16 = vector.shape_cast %15 : vector<1x1x10xf32> to vector<1x10xf32>
    %17 = vector.extract_strided_slice %4 {offsets = [0, 1, 0], sizes = [1, 1, 10], strides = [1, 1, 1]} : vector<2x6x10xf32> to vector<1x1x10xf32>
    %18 = vector.shape_cast %17 : vector<1x1x10xf32> to vector<1x10xf32>
    %19 = vector.extract_strided_slice %4 {offsets = [0, 2, 0], sizes = [1, 1, 10], strides = [1, 1, 1]} : vector<2x6x10xf32> to vector<1x1x10xf32>
    %20 = vector.shape_cast %19 : vector<1x1x10xf32> to vector<1x10xf32>
    %21 = vector.extract_strided_slice %4 {offsets = [0, 3, 0], sizes = [1, 1, 10], strides = [1, 1, 1]} : vector<2x6x10xf32> to vector<1x1x10xf32>
    %22 = vector.shape_cast %21 : vector<1x1x10xf32> to vector<1x10xf32>
    %23 = vector.extract_strided_slice %4 {offsets = [0, 4, 0], sizes = [1, 1, 10], strides = [1, 1, 1]} : vector<2x6x10xf32> to vector<1x1x10xf32>
    %24 = vector.shape_cast %23 : vector<1x1x10xf32> to vector<1x10xf32>
    %25 = vector.extract_strided_slice %4 {offsets = [0, 5, 0], sizes = [1, 1, 10], strides = [1, 1, 1]} : vector<2x6x10xf32> to vector<1x1x10xf32>
    %26 = vector.shape_cast %25 : vector<1x1x10xf32> to vector<1x10xf32>
    %cst = arith.constant dense<0.000000e+00> : vector<8x10xf32>
    %27 = tpu.matmul %9, %12, %cst {dimension_numbers = #tpu.dot_dimension_numbers<[1], [0], [0], [1], [0, 0, 1, 1], [], []>} : vector<8x13xbf16>, vector<13x10xbf16>, vector<8x10xf32> -> vector<8x10xf32>
    %cst_20 = arith.constant dense<0.000000e+00> : vector<8x10xf32>
    %28 = tpu.matmul %10, %14, %cst_20 {dimension_numbers = #tpu.dot_dimension_numbers<[1], [0], [0], [1], [0, 0, 1, 1], [], []>} : vector<8x15xbf16>, vector<15x10xbf16>, vector<8x10xf32> -> vector<8x10xf32>
    %29 = arith.addf %27, %28 : vector<8x10xf32>
    %30 = vector.broadcast %16 : vector<1x10xf32> to vector<8x10xf32>
    %31 = arith.addf %29, %30 : vector<8x10xf32>
    %cst_21 = arith.constant dense<0.000000e+00> : vector<8xf32>
    %32 = vector.multi_reduction <add>, %31, %cst_21 [1] : vector<8x10xf32> to vector<8xf32>
    %33 = vector.shape_cast %32 : vector<8xf32> to vector<8x1xf32>
    %cst_22 = arith.constant 1.000000e+01 : f32
    %34 = vector.broadcast %cst_22 : f32 to vector<8x1xf32>
    %35 = arith.divf %33, %34 : vector<8x1xf32>
    %36 = vector.broadcast %35 : vector<8x1xf32> to vector<8x10xf32>
    %37 = arith.subf %31, %36 : vector<8x10xf32>
    %38 = arith.mulf %37, %37 : vector<8x10xf32>
    %cst_23 = arith.constant dense<0.000000e+00> : vector<8xf32>
    %39 = vector.multi_reduction <add>, %38, %cst_23 [1] : vector<8x10xf32> to vector<8xf32>
    %40 = vector.shape_cast %39 : vector<8xf32> to vector<8x1xf32>
    %cst_24 = arith.constant 1.000000e+01 : f32
    %41 = vector.broadcast %cst_24 : f32 to vector<8x1xf32>
    %42 = arith.divf %40, %41 : vector<8x1xf32>
    %cst_25 = arith.constant 9.99999974E-6 : f32
    %43 = vector.broadcast %cst_25 : f32 to vector<8x1xf32>
    %44 = arith.addf %42, %43 : vector<8x1xf32>
    %45 = math.rsqrt %44 : vector<8x1xf32>
    %46 = vector.broadcast %45 : vector<8x1xf32> to vector<8x10xf32>
    %47 = arith.mulf %37, %46 : vector<8x10xf32>
    %48 = vector.broadcast %18 : vector<1x10xf32> to vector<8x10xf32>
    %49 = arith.mulf %47, %48 : vector<8x10xf32>
    %50 = vector.broadcast %20 : vector<1x10xf32> to vector<8x10xf32>
    %51 = arith.addf %49, %50 : vector<8x10xf32>
    %cst_26 = arith.constant 0.000000e+00 : f32
    %52 = vector.broadcast %cst_26 : f32 to vector<8x10xf32>
    %53 = arith.maximumf %51, %52 : vector<8x10xf32>
    %54 = arith.truncf %53 : vector<8x10xf32> to vector<8x10xbf16>
    %55 = vector.extract_strided_slice %3 {offsets = [0, 0, 0], sizes = [1, 10, 10], strides = [1, 1, 1]} : vector<2x10x10xbf16> to vector<1x10x10xbf16>
    %56 = vector.shape_cast %55 : vector<1x10x10xbf16> to vector<10x10xbf16>
    %cst_27 = arith.constant dense<0.000000e+00> : vector<8x10xf32>
    %57 = tpu.matmul %54, %56, %cst_27 {dimension_numbers = #tpu.dot_dimension_numbers<[1], [0], [0], [1], [0, 0, 1, 1], [], []>} : vector<8x10xbf16>, vector<10x10xbf16>, vector<8x10xf32> -> vector<8x10xf32>
    %58 = vector.broadcast %22 : vector<1x10xf32> to vector<8x10xf32>
    %59 = arith.addf %57, %58 : vector<8x10xf32>
    %cst_28 = arith.constant dense<0.000000e+00> : vector<8xf32>
    %60 = vector.multi_reduction <add>, %59, %cst_28 [1] : vector<8x10xf32> to vector<8xf32>
    %61 = vector.shape_cast %60 : vector<8xf32> to vector<8x1xf32>
    %cst_29 = arith.constant 1.000000e+01 : f32
    %62 = vector.broadcast %cst_29 : f32 to vector<8x1xf32>
    %63 = arith.divf %61, %62 : vector<8x1xf32>
    %64 = vector.broadcast %63 : vector<8x1xf32> to vector<8x10xf32>
    %65 = arith.subf %59, %64 : vector<8x10xf32>
    %66 = arith.mulf %65, %65 : vector<8x10xf32>
    %cst_30 = arith.constant dense<0.000000e+00> : vector<8xf32>
    %67 = vector.multi_reduction <add>, %66, %cst_30 [1] : vector<8x10xf32> to vector<8xf32>
    %68 = vector.shape_cast %67 : vector<8xf32> to vector<8x1xf32>
    %cst_31 = arith.constant 1.000000e+01 : f32
    %69 = vector.broadcast %cst_31 : f32 to vector<8x1xf32>
    %70 = arith.divf %68, %69 : vector<8x1xf32>
    %cst_32 = arith.constant 9.99999974E-6 : f32
    %71 = vector.broadcast %cst_32 : f32 to vector<8x1xf32>
    %72 = arith.addf %70, %71 : vector<8x1xf32>
    %73 = math.rsqrt %72 : vector<8x1xf32>
    %74 = vector.broadcast %73 : vector<8x1xf32> to vector<8x10xf32>
    %75 = arith.mulf %65, %74 : vector<8x10xf32>
    %76 = vector.broadcast %24 : vector<1x10xf32> to vector<8x10xf32>
    %77 = arith.mulf %75, %76 : vector<8x10xf32>
    %78 = vector.broadcast %26 : vector<1x10xf32> to vector<8x10xf32>
    %79 = arith.addf %77, %78 : vector<8x10xf32>
    %cst_33 = arith.constant 0.000000e+00 : f32
    %80 = vector.broadcast %cst_33 : f32 to vector<8x10xf32>
    %81 = arith.maximumf %79, %80 : vector<8x10xf32>
    %82 = vector.extract_strided_slice %2 {offsets = [1, 0, 0], sizes = [1, 13, 10], strides = [1, 1, 1]} : vector<2x28x10xbf16> to vector<1x13x10xbf16>
    %83 = vector.shape_cast %82 : vector<1x13x10xbf16> to vector<13x10xbf16>
    %84 = vector.extract_strided_slice %2 {offsets = [1, 13, 0], sizes = [1, 15, 10], strides = [1, 1, 1]} : vector<2x28x10xbf16> to vector<1x15x10xbf16>
    %85 = vector.shape_cast %84 : vector<1x15x10xbf16> to vector<15x10xbf16>
    %86 = vector.extract_strided_slice %4 {offsets = [1, 0, 0], sizes = [1, 1, 10], strides = [1, 1, 1]} : vector<2x6x10xf32> to vector<1x1x10xf32>
    %87 = vector.shape_cast %86 : vector<1x1x10xf32> to vector<1x10xf32>
    %88 = vector.extract_strided_slice %4 {offsets = [1, 1, 0], sizes = [1, 1, 10], strides = [1, 1, 1]} : vector<2x6x10xf32> to vector<1x1x10xf32>
    %89 = vector.shape_cast %88 : vector<1x1x10xf32> to vector<1x10xf32>
    %90 = vector.extract_strided_slice %4 {offsets = [1, 2, 0], sizes = [1, 1, 10], strides = [1, 1, 1]} : vector<2x6x10xf32> to vector<1x1x10xf32>
    %91 = vector.shape_cast %90 : vector<1x1x10xf32> to vector<1x10xf32>
    %92 = vector.extract_strided_slice %4 {offsets = [1, 3, 0], sizes = [1, 1, 10], strides = [1, 1, 1]} : vector<2x6x10xf32> to vector<1x1x10xf32>
    %93 = vector.shape_cast %92 : vector<1x1x10xf32> to vector<1x10xf32>
    %94 = vector.extract_strided_slice %4 {offsets = [1, 4, 0], sizes = [1, 1, 10], strides = [1, 1, 1]} : vector<2x6x10xf32> to vector<1x1x10xf32>
    %95 = vector.shape_cast %94 : vector<1x1x10xf32> to vector<1x10xf32>
    %96 = vector.extract_strided_slice %4 {offsets = [1, 5, 0], sizes = [1, 1, 10], strides = [1, 1, 1]} : vector<2x6x10xf32> to vector<1x1x10xf32>
    %97 = vector.shape_cast %96 : vector<1x1x10xf32> to vector<1x10xf32>
    %cst_34 = arith.constant dense<0.000000e+00> : vector<8x10xf32>
    %98 = tpu.matmul %9, %83, %cst_34 {dimension_numbers = #tpu.dot_dimension_numbers<[1], [0], [0], [1], [0, 0, 1, 1], [], []>} : vector<8x13xbf16>, vector<13x10xbf16>, vector<8x10xf32> -> vector<8x10xf32>
    %cst_35 = arith.constant dense<0.000000e+00> : vector<8x10xf32>
    %99 = tpu.matmul %10, %85, %cst_35 {dimension_numbers = #tpu.dot_dimension_numbers<[1], [0], [0], [1], [0, 0, 1, 1], [], []>} : vector<8x15xbf16>, vector<15x10xbf16>, vector<8x10xf32> -> vector<8x10xf32>
    %100 = arith.addf %98, %99 : vector<8x10xf32>
    %101 = vector.broadcast %87 : vector<1x10xf32> to vector<8x10xf32>
    %102 = arith.addf %100, %101 : vector<8x10xf32>
    %cst_36 = arith.constant dense<0.000000e+00> : vector<8xf32>
    %103 = vector.multi_reduction <add>, %102, %cst_36 [1] : vector<8x10xf32> to vector<8xf32>
    %104 = vector.shape_cast %103 : vector<8xf32> to vector<8x1xf32>
    %cst_37 = arith.constant 1.000000e+01 : f32
    %105 = vector.broadcast %cst_37 : f32 to vector<8x1xf32>
    %106 = arith.divf %104, %105 : vector<8x1xf32>
    %107 = vector.broadcast %106 : vector<8x1xf32> to vector<8x10xf32>
    %108 = arith.subf %102, %107 : vector<8x10xf32>
    %109 = arith.mulf %108, %108 : vector<8x10xf32>
    %cst_38 = arith.constant dense<0.000000e+00> : vector<8xf32>
    %110 = vector.multi_reduction <add>, %109, %cst_38 [1] : vector<8x10xf32> to vector<8xf32>
    %111 = vector.shape_cast %110 : vector<8xf32> to vector<8x1xf32>
    %cst_39 = arith.constant 1.000000e+01 : f32
    %112 = vector.broadcast %cst_39 : f32 to vector<8x1xf32>
    %113 = arith.divf %111, %112 : vector<8x1xf32>
    %cst_40 = arith.constant 9.99999974E-6 : f32
    %114 = vector.broadcast %cst_40 : f32 to vector<8x1xf32>
    %115 = arith.addf %113, %114 : vector<8x1xf32>
    %116 = math.rsqrt %115 : vector<8x1xf32>
    %117 = vector.broadcast %116 : vector<8x1xf32> to vector<8x10xf32>
    %118 = arith.mulf %108, %117 : vector<8x10xf32>
    %119 = vector.broadcast %89 : vector<1x10xf32> to vector<8x10xf32>
    %120 = arith.mulf %118, %119 : vector<8x10xf32>
    %121 = vector.broadcast %91 : vector<1x10xf32> to vector<8x10xf32>
    %122 = arith.addf %120, %121 : vector<8x10xf32>
    %cst_41 = arith.constant 0.000000e+00 : f32
    %123 = vector.broadcast %cst_41 : f32 to vector<8x10xf32>
    %124 = arith.maximumf %122, %123 : vector<8x10xf32>
    %125 = arith.truncf %124 : vector<8x10xf32> to vector<8x10xbf16>
    %126 = vector.extract_strided_slice %3 {offsets = [1, 0, 0], sizes = [1, 10, 10], strides = [1, 1, 1]} : vector<2x10x10xbf16> to vector<1x10x10xbf16>
    %127 = vector.shape_cast %126 : vector<1x10x10xbf16> to vector<10x10xbf16>
    %cst_42 = arith.constant dense<0.000000e+00> : vector<8x10xf32>
    %128 = tpu.matmul %125, %127, %cst_42 {dimension_numbers = #tpu.dot_dimension_numbers<[1], [0], [0], [1], [0, 0, 1, 1], [], []>} : vector<8x10xbf16>, vector<10x10xbf16>, vector<8x10xf32> -> vector<8x10xf32>
    %129 = vector.broadcast %93 : vector<1x10xf32> to vector<8x10xf32>
    %130 = arith.addf %128, %129 : vector<8x10xf32>
    %cst_43 = arith.constant dense<0.000000e+00> : vector<8xf32>
    %131 = vector.multi_reduction <add>, %130, %cst_43 [1] : vector<8x10xf32> to vector<8xf32>
    %132 = vector.shape_cast %131 : vector<8xf32> to vector<8x1xf32>
    %cst_44 = arith.constant 1.000000e+01 : f32
    %133 = vector.broadcast %cst_44 : f32 to vector<8x1xf32>
    %134 = arith.divf %132, %133 : vector<8x1xf32>
    %135 = vector.broadcast %134 : vector<8x1xf32> to vector<8x10xf32>
    %136 = arith.subf %130, %135 : vector<8x10xf32>
    %137 = arith.mulf %136, %136 : vector<8x10xf32>
    %cst_45 = arith.constant dense<0.000000e+00> : vector<8xf32>
    %138 = vector.multi_reduction <add>, %137, %cst_45 [1] : vector<8x10xf32> to vector<8xf32>
    %139 = vector.shape_cast %138 : vector<8xf32> to vector<8x1xf32>
    %cst_46 = arith.constant 1.000000e+01 : f32
    %140 = vector.broadcast %cst_46 : f32 to vector<8x1xf32>
    %141 = arith.divf %139, %140 : vector<8x1xf32>
    %cst_47 = arith.constant 9.99999974E-6 : f32
    %142 = vector.broadcast %cst_47 : f32 to vector<8x1xf32>
    %143 = arith.addf %141, %142 : vector<8x1xf32>
    %144 = math.rsqrt %143 : vector<8x1xf32>
    %145 = vector.broadcast %144 : vector<8x1xf32> to vector<8x10xf32>
    %146 = arith.mulf %136, %145 : vector<8x10xf32>
    %147 = vector.broadcast %95 : vector<1x10xf32> to vector<8x10xf32>
    %148 = arith.mulf %146, %147 : vector<8x10xf32>
    %149 = vector.broadcast %97 : vector<1x10xf32> to vector<8x10xf32>
    %150 = arith.addf %148, %149 : vector<8x10xf32>
    %cst_48 = arith.constant 0.000000e+00 : f32
    %151 = vector.broadcast %cst_48 : f32 to vector<8x10xf32>
    %152 = arith.maximumf %150, %151 : vector<8x10xf32>
    %153 = tpu.concatenate %81, %152 in 1 : vector<8x10xf32>, vector<8x10xf32> -> vector<8x20xf32>
    %154 = arith.truncf %153 : vector<8x20xf32> to vector<8x20xbf16>
    %cst_49 = arith.constant dense<0.000000e+00> : vector<8x128xf32>
    %155 = tpu.matmul %154, %5, %cst_49 {dimension_numbers = #tpu.dot_dimension_numbers<[1], [0], [0], [1], [0, 0, 1, 1], [], []>} : vector<8x20xbf16>, vector<20x128xbf16>, vector<8x128xf32> -> vector<8x128xf32>
    %cst_50 = arith.constant dense<0.000000e+00> : vector<8x128xf32>
    %156 = tpu.matmul %9, %6, %cst_50 {dimension_numbers = #tpu.dot_dimension_numbers<[1], [0], [0], [1], [0, 0, 1, 1], [], []>} : vector<8x13xbf16>, vector<13x128xbf16>, vector<8x128xf32> -> vector<8x128xf32>
    %157 = arith.addf %155, %156 : vector<8x128xf32>
    %cst_51 = arith.constant dense<0.000000e+00> : vector<8x128xf32>
    %158 = tpu.matmul %10, %7, %cst_51 {dimension_numbers = #tpu.dot_dimension_numbers<[1], [0], [0], [1], [0, 0, 1, 1], [], []>} : vector<8x15xbf16>, vector<15x128xbf16>, vector<8x128xf32> -> vector<8x128xf32>
    %159 = arith.addf %157, %158 : vector<8x128xf32>
    %160 = vector.broadcast %8 : vector<1x128xf32> to vector<8x128xf32>
    %161 = arith.addf %159, %160 : vector<8x128xf32>
    %162 = tpu.iota {dimensions = array<i32: 1>} : vector<8x128xi32>
    %c64_i32 = arith.constant 64 : i32
    %163 = vector.broadcast %c64_i32 : i32 to vector<8x128xi32>
    %164 = arith.cmpi sge, %162, %163 : vector<8x128xi32>
    %cst_52 = arith.constant -2.000000e+00 : f32
    %cst_53 = arith.constant 2.000000e+00 : f32
    %165 = vector.broadcast %cst_52 : f32 to vector<8x128xf32>
    %166 = arith.maximumf %165, %161 : vector<8x128xf32>
    %167 = vector.broadcast %cst_53 : f32 to vector<8x128xf32>
    %168 = arith.minimumf %167, %166 : vector<8x128xf32>
    %169 = arith.select %164, %168, %161 : vector<8x128xi1>, vector<8x128xf32>
    %c0_54 = arith.constant 0 : index
    %c0_55 = arith.constant 0 : index
    %170 = vector.load %arg10[%c0_54, %c0_55] : memref<8x128xf32, #tpu.memory_space<vmem>>, vector<8x128xf32>
    tpu.vector_store %arg10[%c0_54, %c0_55], %169 {strides = array<i32>} : memref<8x128xf32, #tpu.memory_space<vmem>>, vector<8x128xf32>,
    return
  }
  func.func @transform_0(%arg0: i32) -> (i32, i32) {
    %c0_i32 = arith.constant 0 : i32
    %c0_i32_0 = arith.constant 0 : i32
    return %arg0, %c0_i32 : i32, i32
  }
  func.func @transform_1(%arg0: i32) -> (i32, i32) {
    %c0_i32 = arith.constant 0 : i32
    %c0_i32_0 = arith.constant 0 : i32
    return %arg0, %c0_i32 : i32, i32
  }
  func.func @transform_2(%arg0: i32) -> (i32, i32, i32) {
    %c0_i32 = arith.constant 0 : i32
    %c0_i32_0 = arith.constant 0 : i32
    %c0_i32_1 = arith.constant 0 : i32
    %c0_i32_2 = arith.constant 0 : i32
    return %c0_i32, %c0_i32_0, %c0_i32_1 : i32, i32, i32
  }
  func.func @transform_3(%arg0: i32) -> (i32, i32, i32) {
    %c0_i32 = arith.constant 0 : i32
    %c0_i32_0 = arith.constant 0 : i32
    %c0_i32_1 = arith.constant 0 : i32
    %c0_i32_2 = arith.constant 0 : i32
    return %c0_i32, %c0_i32_0, %c0_i32_1 : i32, i32, i32
  }
  func.func @transform_4(%arg0: i32) -> (i32, i32, i32) {
    %c0_i32 = arith.constant 0 : i32
    %c0_i32_0 = arith.constant 0 : i32
    %c0_i32_1 = arith.constant 0 : i32
    %c0_i32_2 = arith.constant 0 : i32
    return %c0_i32, %c0_i32_0, %c0_i32_1 : i32, i32, i32
  }
  func.func @transform_5(%arg0: i32) -> (i32, i32) {
    %c0_i32 = arith.constant 0 : i32
    %c0_i32_0 = arith.constant 0 : i32
    %c0_i32_1 = arith.constant 0 : i32
    return %c0_i32, %c0_i32_0 : i32, i32
  }
  func.func @transform_6(%arg0: i32) -> (i32, i32) {
    %c0_i32 = arith.constant 0 : i32
    %c0_i32_0 = arith.constant 0 : i32
    %c0_i32_1 = arith.constant 0 : i32
    return %c0_i32, %c0_i32_0 : i32, i32
  }
  func.func @transform_7(%arg0: i32) -> (i32, i32) {
    %c0_i32 = arith.constant 0 : i32
    %c0_i32_0 = arith.constant 0 : i32
    %c0_i32_1 = arith.constant 0 : i32
    return %c0_i32, %c0_i32_0 : i32, i32
  }
  func.func @transform_8(%arg0: i32) -> (i32, i32) {
    %c0_i32 = arith.constant 0 : i32
    %c0_i32_0 = arith.constant 0 : i32
    %c0_i32_1 = arith.constant 0 : i32
    return %c0_i32, %c0_i32_0 : i32, i32
  }
  func.func @transform_9(%arg0: i32) -> (i32, i32) {
    %c0_i32 = arith.constant 0 : i32
    %c0_i32_0 = arith.constant 0 : i32
    return %arg0, %c0_i32 : i32, i32
  }
}

</mosaic_0001>

<bundles_post_ra>
// kernel: tpu_custom_call.1
= control target key start
LH: loop header
LB: loop body
LE: loop exit
PB: predicated region body
PF: predicated region fallthrough
CT: control target
= control target key end

     0   :  { %vm90_vm0 = vcmask 1046528   ;;  %v860_v2 = vmov 0.0   ;;  %vm144_vm1 = vcmask 1045504   ;;  %v861_v13 = vmov 65535   ;;  %s1095_s0 = inlined_call_operand.vmem [shape: f32[8,13], index: 0, kind: input, shape index: {}]   ;;  %s1096_s1 = inlined_call_operand.vmem [shape: f32[8,15], index: 1, kind: input, shape index: {}]   ;;  %s1097_s2 = inlined_call_operand.vmem [shape: bf16[2,28,10], index: 2, kind: input, shape index: {}]   ;;  %s1098_s3 = inlined_call_operand.vmem [shape: bf16[2,10,10], index: 3, kind: input, shape index: {}]   ;;  %s1099_s4 = inlined_call_operand.vmem [shape: f32[2,6,10], index: 4, kind: input, shape index: {}]   ;;  %s1100_s5 = inlined_call_operand.vmem [shape: bf16[20,128], index: 5, kind: input, shape index: {}]   ;;  %s1101_s6 = inlined_call_operand.vmem [shape: bf16[13,128], index: 6, kind: input, shape index: {}]   ;;  %s1102_s7 = inlined_call_operand.vmem [shape: bf16[15,128], index: 7, kind: input, shape index: {}]   ;;  %s1103_s8 = inlined_call_operand.vmem [shape: f32[1,128], index: 8, kind: input, shape index: {}]   ;;  %s1104_s9 = inlined_call_operand.hbm [shape: f32[8,128], index: 9, kind: output, shape index: {}]  }
   0x1   :  { %v36_v0 = vld [vmem:[%s1097_s2] sm:$0xf]  ;;  %v37_v1 = vld [vmem:[%s1097_s2 + $0x4] sm:$0xf]  ;;  %761 = vmatprep.subr.bf16.mxu1 %v860_v2  ;;  %v38_v3 = vld [vmem:[%s1097_s2 + $0x8] sm:$0xf]  ;;  %755 = vmatprep.subr.bf16.mxu0 %v860_v2 }
   0x2   :  { %v40_v4 = vld [vmem:[%s1097_s2 + $0x10] sm:$0xf]  ;;  %v41_v5 = vld [vmem:[%s1097_s2 + $0x14] sm:$0xf]  ;;  %v42_v6 = vld [vmem:[%s1097_s2 + $0x18] sm:$0xf]  ;;  %v713_v7 = vcombine.low %v37_v1, %v38_v3  ;;  %v716_v8 = vcombine.low %v36_v0, %v37_v1 }
   0x3   :  { %v723_v9 = vcombine.low %v40_v4, %v41_v5  ;;  %v720_v10 = vcombine.low %v41_v5, %v42_v6  ;;  %v145_v14 = vsel %vm144_vm1, 4294967295, %v861_v13  ;;  %vm862_vm2 = vmmov 0   ;;  %v821_v22 = vld [vmem:[%s1097_s2 + $0xc] ss:$0 sps:$4 sm:$0x33]   ;;  %v34_v27 = vld [vmem:[%s1095_s0] sm:$0xff] }
   0x4   :  { %v70_v11 = vshrl.u32 %v713_v7, 16  ;;  %v73_v12 = vshll.u32 %v713_v7, 16  ;;  %763 = vmatprep.mubr.msk.bf16.mxu1 %vm862_vm2, %v860_v2  ;;  %757 = vmatprep.mubr.msk.bf16.mxu0 %vm862_vm2, %v860_v2  ;;  %v940_v15 = vsel %vm90_vm0, %v145_v14, 0  ;;  %vm91_vm3 = vcmask 1047552  }
   0x5   :  { %v311_v16 = vshrl.u32 %v720_v10, 16  ;;  %v314_v17 = vshll.u32 %v720_v10, 16  ;;  %v148_v18 = vand.u32 %v716_v8, %v940_v15  ;;  %v944_v19 = vand.u32 %v723_v9, %v940_v15  ;;  %v822_v26 = vld [vmem:[%s1097_s2 + $0x1c] ss:$0 sps:$4 sm:$0x33]  }
   0x6   :  { %v72_v20 = vrot.slane %v70_v11, 2  ;;  %v75_v21 = vrot.slane %v73_v12, 3  ;;  %v92_v23 = vsel %vm90_vm0, 4294967295, %v861_v13  ;;  %v78_v28 = vshrl.u32 %v821_v22, 16 }
   0x7   :  { %762 = vmatpush3.bf16.msra.mxu1 %v148_v18  ;;  %v313_v24 = vrot.slane %v311_v16, 2  ;;  %v316_v25 = vrot.slane %v314_v17, 3  ;;  %v81_v29 = vshll.u32 %v821_v22, 16  ;;  %v956_v30 = vpack.c.bf16 %v34_v27, %v34_v27 }
   0x8   :  { %773 = vmatprep.subr.bf16.mxu1 %v860_v2  ;;  %v959_v31 = vsel %vm91_vm3, %v92_v23, 0  ;;  %v319_v32 = vshrl.u32 %v822_v26, 16  ;;  %v322_v33 = vshll.u32 %v822_v26, 16  ;;  %vm140_vm4 = vcmask 105472  }
   0x9   :  { %vm68_vm5 = vsmask.f32 5376  ;;  %v76_v34 = vor.u32 %v75_v21, %v72_v20  ;;  %v80_v35 = vrot.slane %v78_v28, 2  ;;  %v83_v36 = vrot.slane %v81_v29, 3 }
   0xa   :  { %764 = vmatmul.mubr.msk.bf16.vlgmr.msra.gmra.mrb[0].mxu1 %vm140_vm4, %v956_v30  ;;  %v317_v37 = vor.u32 %v316_v25, %v313_v24  ;;  %v321_v38 = vrot.slane %v319_v32, 2  ;;  %v324_v39 = vrot.slane %v322_v33, 3 }
   0xb   :  { %775 = vmatprep.mubr.msk.bf16.mxu1 %vm862_vm2, %v860_v2  ;;  %v84_v40 = vor.u32 %v83_v36, %v80_v35 }
   0xc   :  { %14 = vsyncpa [#allocation3], 0  ;;  %v325_v41 = vor.u32 %v324_v39, %v321_v38  ;;  %v35_v42 = vld [vmem:[%s1096_s1] sm:$0xff]  ;;  %vm86_vm6 = vcmask 121856   ;;  %v190_v48 = vlaneseq  ;;  %vm195_vm7 = vcmask 80896   ;;  %s864_s19 = smov [#allocation2]  }
   0xd   :  { %v85_v43 = vsel %vm68_vm5, %v76_v34, %v84_v40  ;;  %v970_v47 = vpack.c.bf16 %v35_v42, %v35_v42  ;;  %v989_v55 = vld [vmem:[%s1099_s4] sm:$0x3f]  ;;  %vm234_vm8 = vcmask 1044480   ;;  %vm592_vm9 = vcmask 1041408   ;;  %s705_s20 = sshll.u32 %s864_s19, 4  ;;  %s706_s20 = int_to_ptr.vmem [resolvable:$true] %s705_s20 }
   0xe   :  { %v95_v44 = vand.u32 %v959_v31, %v85_v43  ;;  %v326_v45 = vsel %vm68_vm5, %v317_v37, %v325_v41  ;;  %v983_v51 = vshrl.u32 %v190_v48, 7  ;;  %v824_v6 = vld [vmem:[%s1098_s3] sm:$0x1f]   ;;  %vm588_vm10 = vcmask 162816   ;;  %s836_s21 = scalar_lea.vmem %s706_s20, 128  ;;  %p841_p1 = scmp.lt.s32.totalorder %s706_s20, %s706_s20 }
   0xf   :  { %v328_v46 = vand.u32 %v326_v45, %v959_v31  ;;  %v236_v7 = vsel %vm234_vm8, %v824_v6, 0  ;;  %v820_v23 = vld [vmem:[%s1101_s6] sm:$0x7f]   ;;  %p837_p0 = scmp.ne.s32.totalorder %s706_s20, %s836_s21  ;;  %p842_p2 = scmp.lt.s32.totalorder %s836_s21, %s836_s21 }
  0x10   :  { %756 = vmatpush3.bf16.msra.mxu0 %v95_v44  ;;  %v192_v54 = vsub.s32 0, %v983_v51  ;;  %v212_v11 = vsub.s32 1, %v983_v51  ;;  %v217_v12 = vsub.s32 2, %v983_v51  ;;  %v537_v24 = vand.u32 %v820_v23, %v940_v15  ;;  %v823_v25 = vld [vmem:[%s1102_s7] sm:$0xff]  }
  0x11   :  { %767 = vmatprep.subr.bf16.mxu0 %v860_v2  ;;  %774 = vmatpush3.bf16.msra.mxu1 %v328_v46  ;;  %v224_v42 = vsub.s32 3, %v983_v51  ;;  %v826_v23 = vld [vmem:[%s1100_s5] sm:$0xff]   ;;  %p843_p3 = por %p842_p2, %p841_p1 }
  0x12   :  { %785 = vmatprep.subr.bf16.mxu1 %v860_v2  ;;  %v193_v56 = vrot.slane %v989_v55, %v192_v54  ;;  %v213_v13 = vrot.slane %v989_v55, %v212_v11  ;;  %v218_v17 = vrot.slane %v989_v55, %v217_v12 }
  0x13   :  { %758 = vmatmul.mubr.msk.bf16.vlgmr.msra.gmra.mrb[0].mxu0 %vm86_vm6, %v970_v47  ;;  %v225_v45 = vrot.slane %v989_v55, %v224_v42  ;;  %p844_p4 = pnand %p843_p3, %p837_p0 }
  0x14   :  { %769 = vmatprep.mubr.msk.bf16.mxu0 %vm862_vm2, %v860_v2  ;;  %776 = vmatmul.mubr.msk.bf16.vlgmr.msra.gmra.mrb[4].mxu1 %vm86_vm6, %v970_v47 }
  0x15   :  { %787 = vmatprep.mubr.msk.bf16.mxu1 %vm862_vm2, %v860_v2  ;;  %768 = vmatpush3.bf16.msra.mxu0 %v236_v7 }
  0x16   :  { %779 = vmatprep.subr.bf16.mxu0 %v860_v2 }
  0xdd   :  { %v184_v49 = vpop.f32.mrb[0].mxu1 }
  0xde   :  { %v765_v50 = vpop.f32.mrb[1].mxu1 }
  0xdf   :  { %v187_v52 = vpop.f32.mrb[2].mxu1 }
  0xe0   :  { %v766_v53 = vpop.f32.mrb[3].mxu1 }
  0xe1   :  { %v825_v53 = vld [vmem:[%s1098_s3 + $0x8] sm:$0x1f]  }
  0xe6   :  { %v131_v57 = vpop.f32.mrb[0].mxu0 }
  0xe7   :  { %v185_v58 = vadd.f32 %v184_v49, %v131_v57  ;;  %v759_v59 = vpop.f32.mrb[1].mxu0  ;;  %v364_v15 = vpop.f32.mrb[4].mxu1 }
  0xe8   :  { %v134_v60 = vpop.f32.mrb[2].mxu0  ;;  %v777_v26 = vpop.f32.mrb[5].mxu1 }
  0xe9   :  { %v760_v61 = vpop.f32.mrb[3].mxu0  ;;  %v194_v62 = vadd.f32 %v193_v56, %v185_v58  ;;  %v367_v27 = vpop.f32.mrb[6].mxu1 }
  0xea   :  { %v778_v28 = vpop.f32.mrb[7].mxu1  ;;  %v293_v27 = vsub.s32 4, %v983_v51 }
  0xeb   :  { %v196_v63 = vsel %vm195_vm7, %v194_v62, 0.0  ;;  %v298_v28 = vsub.s32 5, %v983_v51 }
  0xec   :  { %197 = vadd.xlane.f32.xlu0 %v196_v63 }
 0x179   :  { %v198_v0 = vpop.xlane.xlu0 %197 }
 0x17a   :  { %v200_v1 = vmul.f32 0.1, %v198_v0 }
 0x17c   :  { %v201_v3 = vsub.f32 %v194_v62, %v200_v1 }
 0x17e   :  { %v202_v4 = vmul.f32 %v201_v3, %v201_v3 }
 0x180   :  { %v203_v5 = vsel %vm195_vm7, %v202_v4, 0.0 }
 0x181   :  { %204 = vadd.xlane.f32.xlu0 %v203_v5 }
 0x20e   :  { %v205_v8 = vpop.xlane.xlu0 %204 }
 0x20f   :  { %v206_v9 = vmul.f32 0.1, %v205_v8 }
 0x211   :  { %v207_v10 = vadd.f32 1e-05, %v206_v9 }
 0x213   :  { %828 = vrsqrt.f32 %v207_v10 }
 0x21d   :  { %v829_v14 = vpop.eup %828 }
 0x21e   :  { %v209_v16 = vmul.f32 %v829_v14, %v201_v3 }
 0x220   :  { %v214_v18 = vmul.f32 %v213_v13, %v209_v16 }
 0x222   :  { %v219_v20 = vadd.f32 %v218_v17, %v214_v18 }
 0x224   :  { %v220_v21 = vmax.f32 %v219_v20, 0.0 }
 0x226   :  { %v221_v22 = vpack.c.bf16 %v220_v21, %v220_v21 }
 0x228   :  { %770 = vmatmul.mubr.msk.bf16.vlgmr.msra.gmra.mrb[4].mxu0 %vm195_vm7, %v221_v22 }
 0x229   :  { %780 = vmatpush3.bf16.msra.mxu0 %v944_v19  ;;  %781 = vmatprep.mubr.msk.bf16.mxu0 %vm862_vm2, %v860_v2  ;;  %v642_v19 = vand.u32 %v823_v25, %v959_v31  ;;  %v1034_v31 = vld [vmem:[%s1099_s4 + $0x8] sm:$0x3f] }
 0x22a   :  { %791 = vmatprep.subr.bf16.mxu0 %v860_v2  ;;  %v437_v0 = vrot.slane %v1034_v31, %v212_v11  ;;  %v442_v4 = vrot.slane %v1034_v31, %v217_v12  ;;  %v449_v9 = vrot.slane %v1034_v31, %v224_v42 }
 0x230   :  { %782 = vmatmul.mubr.msk.bf16.vlgmr.msra.gmra.mrb[8].mxu0 %vm140_vm4, %v956_v30 }
 0x231   :  { %792 = vmatpush3.bf16.msra.mxu0 %v537_v24  ;;  %793 = vmatprep.mubr.msk.bf16.mxu0 %vm862_vm2, %v860_v2  ;;  %v827_v24 = vld [vmem:[%s1100_s5 + $0x8] ss:$0 sps:$4 sm:$0x33]   ;;  %s863_s5 = smov 10  }
 0x232   :  { %805 = vmatprep.subr.bf16.mxu0 %v860_v2  ;;  %v594_v25 = vsel %vm592_vm9, %v827_v24, 0 }
 0x238   :  { %794 = vmatmul.mubr.msk.bf16.vlgmr.msra.gmra.mrb[12].mxu0 %vm140_vm4, %v956_v30  ;;  %v419_v30 = vrot.slane %v1034_v31, %v192_v54  ;;  %v459_v54 = vsel %vm234_vm8, %v825_v53, 0 }
 0x239   :  { %806 = vmatpush3.bf16.msra.mxu0 %v642_v19  ;;  %807 = vmatprep.mubr.msk.bf16.mxu0 %vm862_vm2, %v860_v2 }
 0x23a   :  { %786 = vmatpush3.bf16.msra.mxu1 %v459_v54 }
 0x23b   :  { %797 = vmatprep.subr.bf16.mxu1 %v860_v2 }
 0x240   :  { %808 = vmatmul.mubr.msk.bf16.vlgmr.msra.gmra.mrb[16].mxu0 %vm86_vm6, %v970_v47 }
 0x2fb   :  { %v272_v29 = vpop.f32.mrb[4].mxu0 }
 0x2fc   :  { %v771_v32 = vpop.f32.mrb[5].mxu0  ;;  %v273_v49 = vadd.f32 %v272_v29, %v225_v45  ;;  %v517_v29 = vrot.slane %v1034_v31, %v293_v27 }
 0x2fd   :  { %v275_v33 = vpop.f32.mrb[6].mxu0 }
 0x2fe   :  { %v772_v34 = vpop.f32.mrb[7].mxu0  ;;  %v278_v52 = vsel %vm195_vm7, %v273_v49, 0.0 }
 0x303   :  { %v410_v35 = vpop.f32.mrb[8].mxu0 }
 0x304   :  { %v411_v36 = vadd.f32 %v410_v35, %v364_v15  ;;  %v783_v37 = vpop.f32.mrb[9].mxu0  ;;  %v522_v35 = vrot.slane %v1034_v31, %v298_v28  ;;  %v294_v31 = vrot.slane %v989_v55, %v293_v27 }
 0x305   :  { %v413_v38 = vpop.f32.mrb[10].mxu0 }
 0x306   :  { %v784_v39 = vpop.f32.mrb[11].mxu0  ;;  %v420_v40 = vadd.f32 %v419_v30, %v411_v36 }
 0x308   :  { %v421_v41 = vsel %vm195_vm7, %v420_v40, 0.0 }
 0x309   :  { %422 = vadd.xlane.f32.xlu1 %v421_v41 }
 0x30b   :  { %v573_v32 = vpop.f32.mrb[12].mxu0 }
 0x30c   :  { %v795_v34 = vpop.f32.mrb[13].mxu0 }
 0x30d   :  { %v576_v36 = vpop.f32.mrb[14].mxu0 }
 0x396   :  { %v423_v43 = vpop.xlane.xlu1 %422 }
 0x397   :  { %v424_v44 = vmul.f32 0.1, %v423_v43 }
 0x399   :  { %v425_v46 = vsub.f32 %v420_v40, %v424_v44 }
 0x39b   :  { %v426_v47 = vmul.f32 %v425_v46, %v425_v46 }
 0x39d   :  { %v427_v50 = vsel %vm195_vm7, %v426_v47, 0.0 }
 0x39e   :  { %428 = vadd.xlane.f32.xlu1 %v427_v50  ;;  %v299_v50 = vrot.slane %v989_v55, %v298_v28 }
 0x3a2   :  { %279 = vadd.xlane.f32.xlu1 %v278_v52 }
 0x42b   :  { %v429_v56 = vpop.xlane.xlu1 %428 }
 0x42c   :  { %v430_v57 = vmul.f32 0.1, %v429_v56 }
 0x42e   :  { %v431_v58 = vadd.f32 1e-05, %v430_v57 }
 0x42f   :  { %v280_v59 = vpop.xlane.xlu1 %279 }
 0x430   :  { %830 = vrsqrt.f32 %v431_v58  ;;  %v281_v60 = vmul.f32 0.1, %v280_v59 }
 0x432   :  { %v1047_v61 = vsub.f32 %v273_v49, %v281_v60 }
 0x434   :  { %v283_v62 = vmul.f32 %v1047_v61, %v1047_v61 }
 0x436   :  { %v284_v63 = vsel %vm195_vm7, %v283_v62, 0.0 }
 0x437   :  { %285 = vadd.xlane.f32.xlu1 %v284_v63  ;;  %v693_v63 = vand.u32 127, %v190_v48 }
 0x439   :  { %vm694_vm11 = vcmp.ge.s32.totalorder %v693_v63, 64 }
 0x43a   :  { %v831_v1 = vpop.eup %830 }
 0x43b   :  { %v433_v3 = vmul.f32 %v831_v1, %v425_v46 }
 0x43d   :  { %v438_v5 = vmul.f32 %v437_v0, %v433_v3 }
 0x43f   :  { %v443_v6 = vadd.f32 %v442_v4, %v438_v5 }
 0x441   :  { %v444_v7 = vmax.f32 %v443_v6, 0.0 }
 0x443   :  { %v445_v8 = vpack.c.bf16 %v444_v7, %v444_v7 }
 0x445   :  { %788 = vmatmul.mubr.msk.bf16.vlgmr.msra.gmra.mrb[8].mxu1 %vm195_vm7, %v445_v8 }
 0x446   :  { %801 = vmatprep.mubr.msk.bf16.mxu1 %vm862_vm2, %v860_v2  ;;  %798 = vmatpush3.bf16.msra.mxu1 %v826_v23 }
 0x447   :  { %799 = vmatprep.subr.bf16.mxu1 %v860_v2  ;;  %v796_v2 = vpop.f32.mrb[15].mxu0 }
 0x448   :  { %v678_v38 = vpop.f32.mrb[16].mxu0 }
 0x449   :  { %v809_v39 = vpop.f32.mrb[17].mxu0 }
 0x44a   :  { %800 = vmatpush3.bf16.msra.mxu1 %v594_v25  ;;  %v681_v41 = vpop.f32.mrb[18].mxu0 }
 0x44b   :  { %v810_v42 = vpop.f32.mrb[19].mxu0 }
 0x4c4   :  { %v286_v51 = vpop.xlane.xlu1 %285 }
 0x4c5   :  { %v287_v44 = vmul.f32 0.1, %v286_v51 }
 0x4c7   :  { %v288_v45 = vadd.f32 1e-05, %v287_v44 }
 0x518   :  { %v495_v10 = vpop.f32.mrb[8].mxu1 }
 0x519   :  { %v496_v13 = vadd.f32 %v495_v10, %v449_v9  ;;  %v789_v11 = vpop.f32.mrb[9].mxu1 }
 0x51a   :  { %v498_v14 = vpop.f32.mrb[10].mxu1 }
 0x51b   :  { %v790_v16 = vpop.f32.mrb[11].mxu1  ;;  %v501_v17 = vsel %vm195_vm7, %v496_v13, 0.0 }
 0x51c   :  { %502 = vadd.xlane.f32.xlu0 %v501_v17 }
 0x5a9   :  { %v503_v12 = vpop.xlane.xlu0 %502 }
 0x5aa   :  { %v504_v18 = vmul.f32 0.1, %v503_v12 }
 0x5ac   :  { %v505_v20 = vsub.f32 %v496_v13, %v504_v18 }
 0x5ae   :  { %v506_v21 = vmul.f32 %v505_v20, %v505_v20 }
 0x5b0   :  { %v507_v22 = vsel %vm195_vm7, %v506_v21, 0.0 }
 0x5b1   :  { %508 = vadd.xlane.f32.xlu0 %v507_v22 }
 0x63e   :  { %v509_v19 = vpop.xlane.xlu0 %508 }
 0x63f   :  { %v510_v15 = vmul.f32 0.1, %v509_v19 }
 0x641   :  { %v511_v26 = vadd.f32 1e-05, %v510_v15 }
 0x643   :  { %832 = vrsqrt.f32 %v511_v26 }
 0x644   :  { %834 = vrsqrt.f32 %v288_v45 }
 0x64d   :  { %v833_v33 = vpop.eup %832 }
 0x64e   :  { %v513_v30 = vmul.f32 %v833_v33, %v505_v20  ;;  %v835_v46 = vpop.eup %834 }
 0x64f   :  { %v290_v47 = vmul.f32 %v835_v46, %v1047_v61  ;;  %v734_v61 = vld [vmem:[%s1103_s8] ss:$0 sm:$0xff] }
 0x650   :  { %v518_v37 = vmul.f32 %v517_v29, %v513_v30 }
 0x651   :  { %v295_v49 = vmul.f32 %v294_v31, %v290_v47 }
 0x652   :  { %v523_v40 = vadd.f32 %v522_v35, %v518_v37 }
 0x653   :  { %v300_v52 = vadd.f32 %v299_v50, %v295_v49 }
 0x654   :  { %v524_v43 = vmax.f32 %v523_v40, 0.0 }
 0x655   :  { %v301_v53 = vmax.f32 %v300_v52, 0.0 }
 0x656   :  { %526 = vrot.lane.b32.xlu0 %v524_v43, %s863_s5 }
 0x6c8   :  { %v527_v54 = vpop.permute.xlu0 %526 }
 0x6c9   :  { %v529_v56 = vsel %vm195_vm7, %v301_v53, %v527_v54 }
 0x6ca   :  { %v530_v57 = vpack.c.bf16 %v529_v56, %v529_v56 }
 0x6cc   :  { %802 = vmatmul.mubr.msk.bf16.vlgmr.msra.gmra.mrb[12].mxu1 %vm588_vm10, %v530_v57 }
 0x79f   :  { %v630_v58 = vpop.f32.mrb[12].mxu1 }
 0x7a0   :  { %v631_v59 = vadd.f32 %v630_v58, %v573_v32  ;;  %v803_v60 = vpop.f32.mrb[13].mxu1 }
 0x7a1   :  { %v633_v62 = vpop.f32.mrb[14].mxu1 }
 0x7a2   :  { %v684_v0 = vadd.f32 %v678_v38, %v631_v59  ;;  %v804_v55 = vpop.f32.mrb[15].mxu1 }
 0x7a4   :  { %v691_v1 = vadd.f32 %v734_v61, %v684_v0 }
 0x7a6   :  { %v735_v3 = vclamps-f32 %v691_v1, 2.0 }
 0x7a8   :  { %v697_v4 = vsel %vm694_vm11, %v735_v3, %v691_v1 }
 0x7a9   :  { %698 = vst [vmem:[#allocation2] sm:$0xff] %v697_v4 }
 0x7aa   :  { %847 = shalt.err (!%p844_p4)
}
 0x7ab   :  { %s848_s23 = scalar_lea.hbm %s1104_s9, 128 }
 0x7ac   :  { %p849_p5 = scmp.ne.s32.totalorder %s1104_s9, %s848_s23  ;;  %p852_p6 = scmp.lt.u32.totalorder %s848_s23, %s1104_s9 }
 0x7ae   :  { %p854_p7 = pnand %p852_p6, %p849_p5 }
 0x7b0   :  { %857 = shalt.err (!%p854_p7)
}
 0x7b1   :  { %708 = dma.vmem_to_hbm [thread:$0]  %s706_s20, 128, %s1104_s9, [#allocation3]  }
 0x7b2   :  { %858 = dma.done.wait [#allocation3], 128  }
 0x7b3   :  { %859 = vsyncadd [#allocation3], 4294967168 }
 0x7b4   :  { %712 = vsyncpa [#allocation3], 1 }

</bundles_post_ra>
